<compile_context>
chip_gen: v7x
topology: tpu7x:2x2x1
jax: 0.10.0
libtpu: 0.0.40
codegen_flags: <defaults>
</compile_context>

<pallas_src>
import functools

import jax
import jax.numpy as jnp
from jax.experimental import pallas as pl
from jax.experimental.pallas import tpu as pltpu


def _ce2d_kernel(ignore_index, logits_ref, target_ref, sum_ref, cnt_ref):
    """One grid step = one batch element.

    logits_ref : (C, HW)  f32 VMEM  -- logits, lane-dense (HW multiple of 128)
    target_ref : (1, HW)  i32 VMEM  -- per-pixel class indices
    sum_ref    : (8, 128) f32 VMEM  -- per-batch partial loss sum (broadcast)
    cnt_ref    : (8, 128) f32 VMEM  -- per-batch valid-pixel count (broadcast)
    """
    logits = logits_ref[...]                       # (C, HW) f32
    tgt = target_ref[...]                          # (1, HW) i32
    C, HW = logits.shape

    # Numerically-stable log-sum-exp over the class (sublane) axis.
    m = jnp.max(logits, axis=0, keepdims=True)                    # (1, HW)
    z = jnp.sum(jnp.exp(logits - m), axis=0, keepdims=True)       # (1, HW)
    lse = m + jnp.log(z)                                          # (1, HW)

    # logits[target] via one-hot select (C tiny -> VPU, no gather DMA needed).
    cls = jax.lax.broadcasted_iota(jnp.int32, (C, HW), 0)         # (C, HW)
    picked = jnp.sum(jnp.where(cls == tgt, logits, 0.0),
                     axis=0, keepdims=True)                       # (1, HW)

    valid = tgt != ignore_index                                   # (1, HW) bool
    nll = jnp.where(valid, lse - picked, 0.0)                     # -log p[target]

    psum = jnp.sum(nll)                                           # scalar
    pcnt = jnp.sum(valid.astype(jnp.float32))                     # scalar

    sum_ref[...] = jnp.broadcast_to(psum, sum_ref.shape)
    cnt_ref[...] = jnp.broadcast_to(pcnt, cnt_ref.shape)


def cross_entropy_loss_2d(logits, target, ignore_index=255):
    """logits: (N, C, H, W) f32, target: (N, H, W) int -> scalar mean CE loss.

    Matches nn.CrossEntropyLoss(ignore_index=255, reduction='mean') on 4-D
    input: loss = sum over valid pixels of -log_softmax(logits)[target]
                  / number of valid pixels.
    """
    N, C, H, W = logits.shape
    HW = H * W

    # Lane-dense presentation for the kernel (reshape is free layout plumbing
    # in the wrapper, not an in-kernel VMEM copy).
    logits_flat = logits.reshape(N, C, HW).astype(jnp.float32)
    target_flat = target.reshape(N, 1, HW).astype(jnp.int32)

    kernel = functools.partial(_ce2d_kernel, ignore_index)

    sums, cnts = pl.pallas_call(
        kernel,
        out_shape=(jax.ShapeDtypeStruct((N, 8, 128), jnp.float32),
                   jax.ShapeDtypeStruct((N, 8, 128), jnp.float32)),
        grid=(N,),
        in_specs=[
            pl.BlockSpec((None, C, HW), lambda i: (i, 0, 0)),
            pl.BlockSpec((None, 1, HW), lambda i: (i, 0, 0)),
        ],
        out_specs=(
            pl.BlockSpec((None, 8, 128), lambda i: (i, 0, 0)),
            pl.BlockSpec((None, 8, 128), lambda i: (i, 0, 0)),
        ),
        compiler_params=pltpu.CompilerParams(
            dimension_semantics=("parallel",)),
    )(logits_flat, target_flat)

    total = jnp.sum(sums[:, 0, 0])
    count = jnp.sum(cnts[:, 0, 0])
    # reduction='mean' with ignore_index: mean over valid pixels only.
    return total / count


if __name__ == "__main__":
    N, C, H, W = 2, 4, 16, 16

    key = jax.random.PRNGKey(0)
    kx, kt, ki = jax.random.split(key, 3)

    logits = jax.random.normal(kx, (N, C, H, W), dtype=jnp.float32)
    target = jax.random.randint(kt, (N, H, W), 0, C, dtype=jnp.int32)
    # sprinkle in some ignore_index pixels to exercise the masking path
    ignore_mask = jax.random.bernoulli(ki, 0.1, (N, H, W))
    target = jnp.where(ignore_mask, 255, target)

    loss = cross_entropy_loss_2d(logits, target)
    jax.block_until_ready(loss)

    # pure-JAX reference of nn.CrossEntropyLoss(ignore_index=255, 'mean')
    logp = jax.nn.log_softmax(logits, axis=1)
    tgt_safe = jnp.clip(target, 0, C - 1)
    picked = jnp.take_along_axis(logp, tgt_safe[:, None, :, :], axis=1)[:, 0]
    valid = target != 255
    loss_ref = -jnp.sum(jnp.where(valid, picked, 0.0)) / jnp.sum(valid)

    assert jnp.allclose(loss, loss_ref, rtol=1e-5, atol=1e-6), (loss, loss_ref)

    print("KERNEL_OK")
</pallas_src>

<mosaic_0001>
module attributes {stable_mosaic.version = 11 : i64} {
  func.func @_ce2d_kernel(%arg0: i32, %arg1: memref<1x4x256xf32, #tpu.memory_space<vmem>>, %arg2: memref<1x1x256xi32, #tpu.memory_space<vmem>>, %arg3: memref<1x8x128xf32, #tpu.memory_space<vmem>>, %arg4: memref<1x8x128xf32, #tpu.memory_space<vmem>>) attributes {dimension_semantics = [#tpu.dimension_semantics<parallel>], iteration_bounds = array<i64: 2>, scalar_prefetch = 0 : i64, scratch_operands = 0 : i64, tpu.core_type = #tpu.core_type<tc>, window_params = [{transform_indices = @transform_0, window_bounds = array<i64: 1, 4, 256>}, {transform_indices = @transform_1, window_bounds = array<i64: 1, 1, 256>}, {transform_indices = @transform_2, window_bounds = array<i64: 1, 8, 128>}, {transform_indices = @transform_3, window_bounds = array<i64: 1, 8, 128>}]} {
    %c0 = arith.constant 0 : index
    %c0_0 = arith.constant 0 : index
    %c0_1 = arith.constant 0 : index
    %0 = vector.load %arg1[%c0, %c0_0, %c0_1] : memref<1x4x256xf32, #tpu.memory_space<vmem>>, vector<1x4x256xf32>
    %1 = vector.shape_cast %0 : vector<1x4x256xf32> to vector<4x256xf32>
    %c0_2 = arith.constant 0 : index
    %c0_3 = arith.constant 0 : index
    %c0_4 = arith.constant 0 : index
    %2 = vector.load %arg2[%c0_2, %c0_3, %c0_4] : memref<1x1x256xi32, #tpu.memory_space<vmem>>, vector<1x1x256xi32>
    %3 = vector.shape_cast %2 : vector<1x1x256xi32> to vector<1x256xi32>
    %cst = arith.constant dense<0xFF800000> : vector<256xf32>
    %4 = vector.multi_reduction <maximumf>, %1, %cst [0] : vector<4x256xf32> to vector<256xf32>
    %5 = vector.shape_cast %4 : vector<256xf32> to vector<1x256xf32>
    %6 = vector.broadcast %5 : vector<1x256xf32> to vector<4x256xf32>
    %7 = arith.subf %1, %6 : vector<4x256xf32>
    %8 = math.exp %7 : vector<4x256xf32>
    %cst_5 = arith.constant dense<0.000000e+00> : vector<256xf32>
    %9 = vector.multi_reduction <add>, %8, %cst_5 [0] : vector<4x256xf32> to vector<256xf32>
    %10 = vector.shape_cast %9 : vector<256xf32> to vector<1x256xf32>
    %11 = math.log %10 : vector<1x256xf32>
    %12 = arith.addf %5, %11 : vector<1x256xf32>
    %13 = tpu.iota {dimensions = array<i32: 0>} : vector<4x256xi32>
    %14 = vector.broadcast %3 : vector<1x256xi32> to vector<4x256xi32>
    %15 = arith.cmpi eq, %13, %14 : vector<4x256xi32>
    %cst_6 = arith.constant 0.000000e+00 : f32
    %16 = vector.broadcast %cst_6 : f32 to vector<4x256xf32>
    %17 = arith.select %15, %1, %16 : vector<4x256xi1>, vector<4x256xf32>
    %cst_7 = arith.constant dense<0.000000e+00> : vector<256xf32>
    %18 = vector.multi_reduction <add>, %17, %cst_7 [0] : vector<4x256xf32> to vector<256xf32>
    %19 = vector.shape_cast %18 : vector<256xf32> to vector<1x256xf32>
    %c255_i32 = arith.constant 255 : i32
    %20 = vector.broadcast %c255_i32 : i32 to vector<1x256xi32>
    %21 = arith.cmpi ne, %3, %20 : vector<1x256xi32>
    %22 = arith.subf %12, %19 : vector<1x256xf32>
    %cst_8 = arith.constant 0.000000e+00 : f32
    %23 = vector.broadcast %cst_8 : f32 to vector<1x256xf32>
    %24 = arith.select %21, %22, %23 : vector<1x256xi1>, vector<1x256xf32>
    %25 = vector.shape_cast %24 : vector<1x256xf32> to vector<1x1x256xf32>
    %cst_9 = arith.constant dense<0.000000e+00> : vector<1xf32>
    %26 = vector.multi_reduction <add>, %25, %cst_9 [1, 2] : vector<1x1x256xf32> to vector<1xf32>
    %27 = vector.shape_cast %26 : vector<1xf32> to vector<1x1x1xf32>
    %28 = vector.extract %27[0, 0, 0] : f32 from vector<1x1x1xf32>
    %29 = arith.extui %21 : vector<1x256xi1> to vector<1x256xi32>
    %30 = arith.sitofp %29 : vector<1x256xi32> to vector<1x256xf32>
    %31 = vector.shape_cast %30 : vector<1x256xf32> to vector<1x1x256xf32>
    %cst_10 = arith.constant dense<0.000000e+00> : vector<1xf32>
    %32 = vector.multi_reduction <add>, %31, %cst_10 [1, 2] : vector<1x1x256xf32> to vector<1xf32>
    %33 = vector.shape_cast %32 : vector<1xf32> to vector<1x1x1xf32>
    %34 = vector.extract %33[0, 0, 0] : f32 from vector<1x1x1xf32>
    %35 = vector.broadcast %28 : f32 to vector<8x128xf32>
    %c0_11 = arith.constant 0 : index
    %c0_12 = arith.constant 0 : index
    %c0_13 = arith.constant 0 : index
    %36 = vector.load %arg3[%c0_11, %c0_12, %c0_13] : memref<1x8x128xf32, #tpu.memory_space<vmem>>, vector<1x8x128xf32>
    %37 = vector.shape_cast %36 : vector<1x8x128xf32> to vector<8x128xf32>
    %38 = vector.shape_cast %35 : vector<8x128xf32> to vector<1x8x128xf32>
    tpu.vector_store %arg3[%c0_11, %c0_12, %c0_13], %38 {strides = array<i32>} : memref<1x8x128xf32, #tpu.memory_space<vmem>>, vector<1x8x128xf32>,
    %39 = vector.broadcast %34 : f32 to vector<8x128xf32>
    %c0_14 = arith.constant 0 : index
    %c0_15 = arith.constant 0 : index
    %c0_16 = arith.constant 0 : index
    %40 = vector.load %arg4[%c0_14, %c0_15, %c0_16] : memref<1x8x128xf32, #tpu.memory_space<vmem>>, vector<1x8x128xf32>
    %41 = vector.shape_cast %40 : vector<1x8x128xf32> to vector<8x128xf32>
    %42 = vector.shape_cast %39 : vector<8x128xf32> to vector<1x8x128xf32>
    tpu.vector_store %arg4[%c0_14, %c0_15, %c0_16], %42 {strides = array<i32>} : memref<1x8x128xf32, #tpu.memory_space<vmem>>, vector<1x8x128xf32>,
    return
  }
  func.func @transform_0(%arg0: i32) -> (i32, i32, i32) {
    %c0_i32 = arith.constant 0 : i32
    %c0_i32_0 = arith.constant 0 : i32
    %c0_i32_1 = arith.constant 0 : i32
    return %arg0, %c0_i32, %c0_i32_0 : i32, i32, i32
  }
  func.func @transform_1(%arg0: i32) -> (i32, i32, i32) {
    %c0_i32 = arith.constant 0 : i32
    %c0_i32_0 = arith.constant 0 : i32
    %c0_i32_1 = arith.constant 0 : i32
    return %arg0, %c0_i32, %c0_i32_0 : i32, i32, i32
  }
  func.func @transform_2(%arg0: i32) -> (i32, i32, i32) {
    %c0_i32 = arith.constant 0 : i32
    %c0_i32_0 = arith.constant 0 : i32
    %c0_i32_1 = arith.constant 0 : i32
    return %arg0, %c0_i32, %c0_i32_0 : i32, i32, i32
  }
  func.func @transform_3(%arg0: i32) -> (i32, i32, i32) {
    %c0_i32 = arith.constant 0 : i32
    %c0_i32_0 = arith.constant 0 : i32
    %c0_i32_1 = arith.constant 0 : i32
    return %arg0, %c0_i32, %c0_i32_0 : i32, i32, i32
  }
}

</mosaic_0001>

<bundles_post_ra>
// kernel: tpu_custom_call.1
= control target key start
LH: loop header
LB: loop body
LE: loop exit
PB: predicated region body
PF: predicated region fallthrough
CT: control target
= control target key end

     0   :  { %9 = vsyncpa [#allocation3], 0  ;;  %s1090_s0 = inlined_call_operand.hbm [shape: f32[2,4,256], index: 0, kind: input, shape index: {}]   ;;  %s1091_s1 = inlined_call_operand.hbm [shape: s32[2,1,256], index: 1, kind: input, shape index: {}]   ;;  %s1092_s2 = inlined_call_operand.hbm [shape: f32[2,8,128], index: 2, kind: output, shape index: {0}]   ;;  %s1093_s3 = inlined_call_operand.hbm [shape: f32[2,8,128], index: 3, kind: output, shape index: {1}]  }
   0x1   :  { %11 = vsyncpa [#allocation3 + $0x1], 0 }
   0x2   :  { %12 = vsyncpa [#allocation6], 0 }
   0x3   :  { %14 = vsyncpa [#allocation6 + $0x1], 0 }
   0x4   :  { %15 = vsyncpa [#allocation4], 0 }
   0x5   :  { %17 = vsyncpa [#allocation4 + $0x1], 0 }
   0x6   :  { %18 = vsyncpa [#allocation9], 0 }
   0x7   :  { %20 = vsyncpa [#allocation9 + $0x1], 0  ;;  %s828_s12 = smov 0   ;;  %s830_s13 = smov 0  }
   0x8   :  { %s832_s14 = smov 0   ;;  %s834_s15 = smov 0  }
   0x9 LB: > { %s849_s16 = sadd.s32 4294967295, %s800_s15   ;;  %s546_s17 = sadd.s32 4294967294, %s800_s15   ;;  %s800_s15 = sphi %s834_s15, %s1112_s15   ;;  %s796_s14 = sphi %s832_s14, %s1111_s14   ;;  %s792_s13 = sphi %s830_s13, %s1110_s13   ;;  %s788_s12 = sphi %s828_s12, %s1109_s12  }
   0xa   : > { %s853_s18 = sadd.s32 1, %s800_s15   ;;  %s33_s19 = sadd.s32 1, %s796_s14 }
   0xb   : > { %s30_s20 = ssub.s32 %s800_s15, %s853_s18  ;;  %p40_p0 = scmp.ne.s32.totalorder %s796_s14, %s792_s13 }
   0xc   : > { %p31_p1 = scmp.eq.s32.totalorder %s30_s20, 0  ;;  %p41_p2 = scmp.eq.s32.totalorder %s800_s15, 0 }
   0xd   : > { %p46_p3 = scmp.ne.s32.totalorder %s792_s13, %s788_s12  ;;  %p47_p4 = scmp.eq.s32.totalorder %s849_s16, 0 }
   0xe   : > { %s865_s21 = scalar_select %p31_p1, %s796_s14, %s33_s19  }
   0xf   : > { %p867_p5 = por %p41_p2, %p40_p0  ;;  %p871_p6 = por %p47_p4, %p46_p3 }
  0x10   : > { %p96_p7 = scmp.eq.s32.totalorder %s849_s16, 1  ;;  %p102_p8 = scmp.eq.s32.totalorder %s546_s17, 1 }
  0x11   : > { %s1097_s23 = scalar_select %p871_p6, 1, 0 }
  0x12   : > { %p595_p10 = scmp.lt.s32.totalorder %s800_s15, 2  ;;  %p878_p11 = por %p96_p7, %p40_p0 }
  0x13   : > { %p882_p12 = por %p102_p8, %p46_p3  ;;  %s887_s26 = sand.u32 1, %s796_s14  }
  0x14   : > { %s1098_s24 = scalar_select %p878_p11, 1, 0 }
  0x15   : > { %s1099_s25 = scalar_select %p882_p12, 1, 0 }
  0x16   : > { %s567_s27 = sshll.u32 %s800_s15, 7  ;;  %s549_s28 = sshll.u32 %s887_s26, 3 }
  0x17   : > { %s894_s4 = scalar_lea.hbm %s1090_s0, %s567_s27  ;;  %s152_s5 = scalar_lea.vmem [#allocation2], %s549_s28 }
  0x18   : > { %s160_s6 = sshll.u32 %s152_s5, 4  ;;  %p898_p13 = pnand %p595_p10, %p867_p5  ;;  %s902_s6 = int_to_ptr.vmem [resolvable:$true] %s160_s6 }
  0x19   : > { %s149_s8 = scalar_lea.sflag [#allocation3], %s887_s26  ;;  %s638_s9 = scalar_lea.hbm %s894_s4, 128 }
  0x1a   : > { %p639_p2 = scmp.ne.s32.totalorder %s894_s4, %s638_s9  ;;  %p640_p3 = pneg %p898_p13 }
  0x1b   : > { %s643_s17 = scalar_lea.hbm %s1090_s0, 256  ;;  %p644_p5 = scmp.lt.u32.totalorder %s894_s4, %s1090_s0 }
  0x1c   : > { %p641_p4 = pnand %p640_p3, %p639_p2  ;;  %p645_p8 = scmp.lt.u32.totalorder %s643_s17, %s638_s9 }
  0x1d   : > { %p647_p9 = scmp.lt.u32.totalorder %s638_s9, %s894_s4 }
  0x1e   : > { %p642_p7 = pneg %p641_p4  ;;  %p646_p10 = por %p645_p8, %p644_p5 }
  0x20   : > { %p648_p0 = por %p647_p9, %p646_p10 }
  0x22   : > { %p649_p1 = pnand %p648_p0, %p642_p7 }
  0x24   : > { %652 = shalt.err (!%p649_p1)
}
  0x25   : > { %s653_s22 = scalar_lea.vmem %s902_s6, 128  ;;  %s802_s27 = smov [#allocation2]  }
  0x26   : > { %p654_p2 = scmp.ne.s32.totalorder %s902_s6, %s653_s22  ;;  %s658_s28 = sshll.u32 %s802_s27, 4  ;;  %s659_s28 = int_to_ptr.vmem [resolvable:$false] %s658_s28 }
  0x27   : > { %s660_s29 = scalar_lea.vmem %s659_s28, 256  ;;  %p661_p11 = scmp.lt.s32.totalorder %s902_s6, %s659_s28 }
  0x28   : > { %p656_p4 = pnand %p654_p2, %p640_p3  ;;  %p662_p5 = scmp.lt.s32.totalorder %s660_s29, %s653_s22 }
  0x2a   : > { %p657_p12 = pneg %p656_p4  ;;  %p663_p8 = por %p662_p5, %p661_p11 }
  0x2c   : > { %p664_p9 = pnand %p663_p8, %p657_p12 }
  0x2e   : > { %667 = shalt.err (!%p664_p9)
}
  0x2f   : > { %584 = dma.hbm_to_vmem [thread:$0]  (!%p898_p13), %s894_s4, 128, %s902_s6, %s149_s8  }
  0x30   : > { %p1101_p0 = scmp.lt.s32.totalorder %s800_s15, 3  ;;  %p1102_p1 = scmp.ge.s32.totalorder %s800_s15, 1 }
  0x31   : > { %s552_s5 = sshll.u32 %s887_s26, 1  ;;  %s568_s9 = sshll.u32 %s800_s15, 5 }
  0x32   : > { %p936_p7 = pnand %p1102_p1, %p1101_p0  ;;  %s945_s17 = scalar_lea.hbm %s1091_s1, %s568_s9 }
  0x33   : > { %s171_s19 = scalar_lea.vmem [#allocation5], %s552_s5  ;;  %s168_s4 = scalar_lea.sflag [#allocation6], %s887_s26 }
  0x34   : > { %s1103_s30 = scalar_select %p936_p7, 1, 0 }
  0x35   : > { %s179_s20 = sshll.u32 %s171_s19, 4  ;;  %s668_s6 = scalar_lea.hbm %s945_s17, 32  ;;  %s180_s20 = int_to_ptr.vmem [resolvable:$true] %s179_s20 }
  0x36   : > { %p669_p11 = scmp.ne.s32.totalorder %s945_s17, %s668_s6  ;;  %s673_s27 = scalar_lea.hbm %s1091_s1, 64 }
  0x37   : > { %p674_p2 = scmp.lt.u32.totalorder %s945_s17, %s1091_s1  ;;  %p675_p4 = scmp.lt.u32.totalorder %s673_s27, %s668_s6 }
  0x38   : > { %p671_p12 = pnand %p669_p11, %p640_p3  ;;  %p677_p8 = scmp.lt.u32.totalorder %s668_s6, %s945_s17 }
  0x39   : > { %p676_p5 = por %p675_p4, %p674_p2 }
  0x3a   : > { %p672_p10 = pneg %p671_p12 }
  0x3b   : > { %p678_p9 = por %p677_p8, %p676_p5 }
  0x3d   : > { %p679_p0 = pnand %p678_p9, %p672_p10 }
  0x3f   : > { %682 = shalt.err (!%p679_p0)
}
  0x40   : > { %s683_s26 = scalar_lea.vmem %s180_s20, 32  ;;  %s803_s5 = smov [#allocation5]  }
  0x41   : > { %p684_p1 = scmp.ne.s32.totalorder %s180_s20, %s683_s26  ;;  %s688_s9 = sshll.u32 %s803_s5, 4  ;;  %s689_s9 = int_to_ptr.vmem [resolvable:$false] %s688_s9 }
  0x42   : > { %s690_s10 = scalar_lea.vmem %s689_s9, 64  ;;  %p691_p6 = scmp.lt.s32.totalorder %s180_s20, %s689_s9 }
  0x43   : > { %p686_p11 = pnand %p684_p1, %p640_p3  ;;  %p692_p7 = scmp.lt.s32.totalorder %s690_s10, %s683_s26 }
  0x45   : > { %p687_p12 = pneg %p686_p11  ;;  %p693_p2 = por %p692_p7, %p691_p6 }
  0x47   : > { %p694_p4 = pnand %p693_p2, %p687_p12 }
  0x49   : > { %697 = shalt.err (!%p694_p4)
}
  0x4a   : > { %587 = dma.hbm_to_vmem [thread:$0]  (!%p898_p13), %s945_s17, 32, %s180_s20, %s168_s4  }
  0x4b   : > { %p1104_p10 = scmp.ne.s32.totalorder %s1103_s30, 0 }
  0x4c   : > { %s970_s11 = sand.u32 (!%p1104_p10), 1, %s792_s13   ;;  %p1105_p6 = scmp.ne.s32.totalorder (!%p1104_p10), %s1097_s23, 0 }
  0x4d   : > { %188 = sbr.rel (%p1104_p10) target bundleno = 408 (0x198), region = 28  ;;  %s973_s19 = sshll.u32 (!%p1104_p10), %s970_s11, 3 }
  0x4e   : > { %s191_s6 = scalar_lea.sflag (!%p1104_p10), [#allocation3], %s970_s11  ;;  %s194_s8 = scalar_lea.vmem (!%p1104_p10), [#allocation2], %s973_s19 }
  0x54   : > { %771 = dma.done.wait (%p1105_p6), %s191_s6, 128  }
  0x55   : > { %773 = vsyncadd (%p1105_p6), %s191_s6, 4294967168  ;;  %s557_s7 = sshll.u32 %s970_s11, 1  ;;  %s200_s30 = scalar_lea.sflag [#allocation6], %s970_s11 }
  0x56   : > { %s203_s17 = scalar_lea.vmem [#allocation5], %s557_s7 }
  0x57   : > { %775 = dma.done.wait (%p1105_p6), %s200_s30, 32  }
  0x58   : > { %777 = vsyncadd (%p1105_p6), %s200_s30, 4294967264  ;;  %vm241_vm0 = vcmask 1043456   ;;  %v236_v0 = vld [vmem:[%s194_s8] sm:$0xff]  ;;  %v286_v15 = vlaneseq  ;;  %v237_v22 = vld [vmem:[%s203_s17] sm:$0x3]  ;;  %vm347_vm4 = vcmask 1040384  }
  0x59   : > { %v239_v1 = vcombine.high %v236_v0, %v236_v0  ;;  %v242_v2 = vsel %vm241_vm0, %v236_v0, -inf  ;;  %v804_v56 = vmov 1966171168   ;;  %vm314_vm3 = vcmp.ne.s32.totalorder %v237_v22, 255  ;;  %s563_s23 = sshll.u32 %s849_s16, 7  ;;  %s228_s20 = scalar_lea.vmem [#allocation7], %s973_s19 }
  0x5a   : > { %v243_v3 = vrot.slane %v242_v2, 4  ;;  %v287_v18 = vshrl.u32 %v286_v15, 7  ;;  %v321_v57 = vunpack.c.l.s4 %v804_v56  ;;  %s408_s4 = sshll.u32 %s228_s20, 4  ;;  %s235_s22 = scalar_lea.vmem [#allocation8], %s973_s19  ;;  %s1015_s4 = int_to_ptr.vmem [resolvable:$true] %s408_s4 }
  0x5b   : > { %v249_v4 = vsel %vm241_vm0, %v239_v1, -inf  ;;  %s421_s27 = sshll.u32 %s235_s22, 4  ;;  %s1013_s26 = scalar_lea.hbm %s1092_s2, %s563_s23  ;;  %s1017_s27 = int_to_ptr.vmem [resolvable:$true] %s421_s27 }
  0x5c   : > { %v244_v5 = vmax.f32 %v242_v2, %v243_v3  ;;  %v250_v6 = vrot.slane %v249_v4, 4  ;;  %v989_v21 = vsub.s32 0, %v287_v18  ;;  %v991_v23 = vsub.s32 1, %v287_v18  ;;  %s390_s9 = scalar_lea.sflag [#allocation4], %s970_s11  ;;  %s698_s10 = scalar_lea.vmem %s1015_s4, 128 }
  0x5d   : > { %p699_p13 = scmp.ne.s32.totalorder %s1015_s4, %s698_s10  ;;  %p1106_p3 = scmp.ne.s32.totalorder %s1098_s24, 0 }
  0x5e   : > { %v245_v7 = vrot.slane %v244_v5, 2  ;;  %v251_v8 = vmax.f32 %v249_v4, %v250_v6  ;;  %v291_v24 = vrot.slane %v237_v22, %v989_v21  ;;  %v295_v25 = vrot.slane %v237_v22, %v991_v23  ;;  %s806_s6 = smov [#allocation7]  }
  0x5f   : > { %p700_p7 = pnand %p699_p13, %p1106_p3  ;;  %s702_s8 = sshll.u32 %s806_s6, 4  ;;  %s703_s8 = int_to_ptr.vmem [resolvable:$false] %s702_s8 }
  0x60   : > { %v246_v9 = vmax.f32 %v244_v5, %v245_v7  ;;  %v252_v10 = vrot.slane %v251_v8, 2  ;;  %vm296_vm1 = vcmp.eq.s32.totalorder %v287_v18, %v291_v24  ;;  %vm297_vm2 = vcmp.eq.s32.totalorder %v287_v18, %v295_v25  ;;  %s704_s7 = scalar_lea.vmem %s703_s8, 256  ;;  %p705_p8 = scmp.lt.s32.totalorder %s1015_s4, %s703_s8 }
  0x61   : > { %v298_v26 = vsel %vm296_vm1, %v236_v0, 0.0  ;;  %v299_v30 = vsel %vm297_vm2, %v239_v1, 0.0  ;;  %v322_v1 = vunpack.c.0.s8 %v321_v57  ;;  %p701_p5 = pneg %p700_p7  ;;  %p706_p9 = scmp.lt.s32.totalorder %s704_s7, %s698_s10 }
  0x62   : > { %v247_v11 = vrot.slane %v246_v9, 1  ;;  %v253_v12 = vmax.f32 %v251_v8, %v252_v10  ;;  %v300_v32 = vsel %vm241_vm0, %v298_v26, 0.0  ;;  %v307_v36 = vsel %vm241_vm0, %v299_v30, 0.0 }
  0x63   : > { %v301_v37 = vrot.slane %v300_v32, 4  ;;  %v308_v40 = vrot.slane %v307_v36, 4  ;;  %v325_v5 = vsub.s32 %v322_v1, %v287_v18  ;;  %v805_v8 = vmov 0.0   ;;  %p707_p0 = por %p706_p9, %p705_p8 }
  0x64   : > { %v248_v13 = vmax.f32 %v246_v9, %v247_v11  ;;  %v254_v14 = vrot.slane %v253_v12, 1  ;;  %v560_v9 = vsel %vm314_vm3, 1.0, %v805_v8 }
  0x65   : > { %v302_v43 = vadd.f32 %v301_v37, %v300_v32  ;;  %v309_v46 = vadd.f32 %v308_v40, %v307_v36  ;;  %v366_v11 = vrot.slane %v560_v9, %v989_v21  ;;  %p708_p1 = pnand %p707_p0, %p701_p5 }
  0x66   : > { %v255_v16 = vmax.f32 %v253_v12, %v254_v14  ;;  %v370_v12 = vrot.slane %v560_v9, %v991_v23 }
  0x67   : > { %v303_v49 = vrot.slane %v302_v43, 2  ;;  %v310_v51 = vrot.slane %v309_v46, 2 }
  0x68   : > { %v258_v17 = vcombine.low %v248_v13, %v255_v16  ;;  %v374_v18 = vsel %vm347_vm4, %v370_v12, 0.0 }
  0x69   : > { %v304_v52 = vadd.f32 %v303_v49, %v302_v43  ;;  %v311_v53 = vadd.f32 %v310_v51, %v309_v46 }
  0x6a   : > { %v260_v19 = vsub.f32 %v236_v0, %v258_v17 }
  0x6b   : > { %v305_v54 = vrot.slane %v304_v52, 1  ;;  %v312_v55 = vrot.slane %v311_v53, 1 }
  0x6c   : > { %v261_v20 = vmul.f32 1.442695, %v260_v19  ;;  %v373_v19 = vsel %vm347_vm4, %v366_v11, 0.0 }
  0x6d   : > { %v306_v60 = vadd.f32 %v305_v54, %v304_v52  ;;  %v313_v0 = vadd.f32 %v312_v55, %v311_v53  ;;  %v375_v22 = vadd.f32 %v374_v18, %v373_v19 }
  0x6e   : > { %632 = vpow2.f32 %v261_v20 }
  0x78   : > { %v633_v27 = vpop.eup %632 }
  0x79   : > { %v264_v28 = vcombine.high %v633_v27, %v633_v27  ;;  %v266_v29 = vsel %vm241_vm0, %v633_v27, 0.0 }
  0x7a   : > { %v267_v31 = vrot.slane %v266_v29, 4 }
  0x7b   : > { %v273_v33 = vsel %vm241_vm0, %v264_v28, 0.0 }
  0x7c   : > { %v268_v34 = vadd.f32 %v267_v31, %v266_v29  ;;  %v274_v35 = vrot.slane %v273_v33, 4 }
  0x7e   : > { %v269_v38 = vrot.slane %v268_v34, 2  ;;  %v275_v39 = vadd.f32 %v274_v35, %v273_v33 }
  0x80   : > { %v270_v41 = vadd.f32 %v269_v38, %v268_v34  ;;  %v276_v42 = vrot.slane %v275_v39, 2 }
  0x82   : > { %v271_v44 = vrot.slane %v270_v41, 1  ;;  %v277_v45 = vadd.f32 %v276_v42, %v275_v39 }
  0x84   : > { %v272_v47 = vadd.f32 %v271_v44, %v270_v41  ;;  %v278_v48 = vrot.slane %v277_v45, 1 }
  0x86   : > { %v279_v50 = vadd.f32 %v278_v48, %v277_v45  ;;  %634 = vlog2.f32 %v272_v47 }
  0x88   : > { %636 = vlog2.f32 %v279_v50 }
  0x90   : > { %v635_v58 = vpop.eup %634 }
  0x91   : > { %v281_v59 = vmul.f32 0.6931472, %v635_v58 }
  0x92   : > { %v637_v61 = vpop.eup %636 }
  0x93   : > { %v283_v62 = vmul.f32 0.6931472, %v637_v61  ;;  %v284_v63 = vadd.f32 %v281_v59, %v248_v13 }
  0x95   : > { %v285_v2 = vadd.f32 %v283_v62, %v255_v16  ;;  %v315_v3 = vsub.f32 %v284_v63, %v306_v60 }
  0x97   : > { %v316_v4 = vsub.f32 %v285_v2, %v313_v0 }
  0x99   : > { %v319_v6 = vcombine.low %v315_v3, %v316_v4 }
  0x9b   : > { %v326_v7 = vrot.slane %v319_v6, %v325_v5 }
  0x9d   : > { %v333_v10 = vrot.slane %v326_v7, %v325_v5 }
  0x9f   : > { %v335_v14 = vsel %vm314_vm3, %v333_v10, 0.0 }
  0xa0   : > { %v340_v13 = vrot.slane %v335_v14, %v989_v21  ;;  %v344_v15 = vrot.slane %v335_v14, %v991_v23 }
  0xa2   : > { %v348_v16 = vsel %vm347_vm4, %v340_v13, 0.0  ;;  %v349_v17 = vsel %vm347_vm4, %v344_v15, 0.0 }
  0xa3   : > { %v350_v20 = vadd.f32 %v349_v17, %v348_v16 }
  0xa5   : > { %351 = vadd.xlane.f32.xlu0 %v350_v20 }
  0xa9   : > { %376 = vadd.xlane.f32.xlu0 %v375_v22 }
 0x132   : > { %v352_v24 = vpop.xlane.xlu0 %351 }
 0x133   : > { %v353_v25 = vrot.slane %v352_v24, 4 }
 0x135   : > { %v354_v26 = vadd.f32 %v353_v25, %v352_v24 }
 0x136   : > { %v377_v27 = vpop.xlane.xlu0 %376 }
 0x137   : > { %v355_v28 = vrot.slane %v354_v26, 2  ;;  %v378_v21 = vrot.slane %v377_v27, 4 }
 0x139   : > { %v379_v23 = vadd.f32 %v378_v21, %v377_v27  ;;  %v356_v29 = vadd.f32 %v355_v28, %v354_v26 }
 0x13b   : > { %v380_v30 = vrot.slane %v379_v23, 2  ;;  %v357_v31 = vrot.slane %v356_v29, 1 }
 0x13d   : > { %v381_v32 = vadd.f32 %v380_v30, %v379_v23  ;;  %v358_v33 = vadd.f32 %v357_v31, %v356_v29 }
 0x13f   : > { %569 = vpush %v358_v33  ;;  %v382_v34 = vrot.slane %v381_v32, 1 }
 0x141   : > { %v383_v35 = vadd.f32 %v382_v34, %v381_v32 }
 0x143   : > { %571 = vpush %v383_v35 }
 0x170   : > { %s570_s5 = spop %569 }
 0x171   : > { %v385_v36 = vstv %s570_s5 }
 0x172   : > { %386 = vst [vmem:[%s228_s20] sm:$0xff] %v385_v36 }
 0x173   : > { %711 = shalt.err (!%p708_p1)
}
 0x174   : > { %s712_s30 = scalar_lea.hbm %s1013_s26, 128  ;;  %s716_s28 = scalar_lea.hbm %s1092_s2, 256 }
 0x175   : > { %p713_p11 = scmp.ne.s32.totalorder %s1013_s26, %s712_s30  ;;  %p717_p4 = scmp.lt.u32.totalorder %s1013_s26, %s1092_s2 }
 0x176   : > { %p718_p10 = scmp.lt.u32.totalorder %s716_s28, %s712_s30  ;;  %p720_p13 = scmp.lt.u32.totalorder %s712_s30, %s1013_s26 }
 0x177   : > { %p714_p12 = pnand %p713_p11, %p1106_p3 }
 0x178   : > { %p719_p6 = por %p718_p10, %p717_p4 }
 0x179   : > { %p715_p2 = pneg %p714_p12 }
 0x17a   : > { %p721_p7 = por %p720_p13, %p719_p6 }
 0x17c   : > { %p722_p5 = pnand %p721_p7, %p715_p2 }
 0x17e   : > { %725 = shalt.err (!%p722_p5)
}
 0x17f   : > { %577 = dma.vmem_to_hbm [thread:$0]  (%p1106_p3), %s1015_s4, 128, %s1013_s26, %s390_s9  }
 0x180   : > { %s572_s10 = spop %571  ;;  %s1046_s7 = scalar_lea.hbm %s1093_s3, %s563_s23 }
 0x181   : > { %v387_v37 = vstv %s572_s10  ;;  %s395_s30 = scalar_lea.sflag [#allocation9], %s970_s11  ;;  %s726_s17 = scalar_lea.vmem %s1017_s27, 128 }
 0x182   : > { %388 = vst [vmem:[%s235_s22] sm:$0xff] %v387_v37  ;;  %p727_p8 = scmp.ne.s32.totalorder %s1017_s27, %s726_s17  ;;  %s807_s20 = smov [#allocation8]  }
 0x183   : > { %s730_s28 = sshll.u32 %s807_s20, 4  ;;  %s731_s28 = int_to_ptr.vmem [resolvable:$false] %s730_s28 }
 0x184   : > { %p728_p9 = pnand %p727_p8, %p1106_p3  ;;  %s732_s4 = scalar_lea.vmem %s731_s28, 256 }
 0x185   : > { %p733_p1 = scmp.lt.s32.totalorder %s1017_s27, %s731_s28  ;;  %p734_p11 = scmp.lt.s32.totalorder %s732_s4, %s726_s17 }
 0x186   : > { %p729_p0 = pneg %p728_p9 }
 0x187   : > { %p735_p12 = por %p734_p11, %p733_p1 }
 0x189   : > { %p736_p2 = pnand %p735_p12, %p729_p0 }
 0x18b   : > { %739 = shalt.err (!%p736_p2)
}
 0x18c   : > { %s740_s16 = scalar_lea.hbm %s1046_s7, 128  ;;  %s744_s23 = scalar_lea.hbm %s1093_s3, 256 }
 0x18d   : > { %p741_p4 = scmp.ne.s32.totalorder %s1046_s7, %s740_s16  ;;  %p745_p13 = scmp.lt.u32.totalorder %s1046_s7, %s1093_s3 }
 0x18e   : > { %p746_p7 = scmp.lt.u32.totalorder %s744_s23, %s740_s16  ;;  %p748_p8 = scmp.lt.u32.totalorder %s740_s16, %s1046_s7 }
 0x18f   : > { %p742_p10 = pnand %p741_p4, %p1106_p3 }
 0x190   : > { %p747_p5 = por %p746_p7, %p745_p13 }
 0x191   : > { %p743_p6 = pneg %p742_p10 }
 0x192   : > { %p749_p9 = por %p748_p8, %p747_p5 }
 0x194   : > { %p750_p0 = pnand %p749_p9, %p743_p6 }
 0x196   : > { %753 = shalt.err (!%p750_p0)
}
 0x197   : > { %578 = dma.vmem_to_hbm [thread:$0]  (%p1106_p3), %s1017_s27, 128, %s1046_s7, %s395_s30  }
 0x198 PF: > { %s433_s9 = sand.u32 1, %s788_s12   ;;  %p1107_p1 = scmp.ne.s32.totalorder %s1099_s25, 0 }
 0x199   : > { %p1108_p11 = scmp.ge.s32.totalorder %s800_s15, 2  ;;  %s434_s29 = scalar_lea.sflag [#allocation4], %s433_s9 }
 0x19b   : > { %p589_p12 = pnand %p1108_p11, %p1107_p1 }
 0x19d   : > { %779 = dma.done.wait (!%p589_p12), %s434_s29, 128  }
 0x19e   : > { %781 = vsyncadd (!%p589_p12), %s434_s29, 4294967168  ;;  %s443_s5 = scalar_lea.sflag [#allocation9], %s433_s9 }
 0x19f   : > { %783 = dma.done.wait (!%p589_p12), %s443_s5, 128  }
 0x1a0   : > { %785 = vsyncadd (!%p589_p12), %s443_s5, 4294967168  ;;  %p23_p3 = scmp.ge.s32.totalorder %s853_s18, 4   ;;  %s1109_s12 = smov %s792_s13 }
 0x1a1   : > { %s1110_s13 = smov %s796_s14  ;;  %s1111_s14 = smov %s865_s21 }
 0x1a2   : > { %s1112_s15 = smov %s853_s18  ;;  %25 = sbr.rel (!%p23_p3) target bundleno = 9 (0x9), region = 103 }
 0x1a9   :  { %448 = vsyncpa [#allocation3], 1 }
 0x1aa   :  { %450 = vsyncpa [#allocation3 + $0x1], 1 }
 0x1ab   :  { %451 = vsyncpa [#allocation6], 1 }
 0x1ac   :  { %453 = vsyncpa [#allocation6 + $0x1], 1 }
 0x1ad   :  { %454 = vsyncpa [#allocation4], 1 }
 0x1ae   :  { %456 = vsyncpa [#allocation4 + $0x1], 1 }
 0x1af   :  { %457 = vsyncpa [#allocation9], 1 }
 0x1b0   :  { %459 = vsyncpa [#allocation9 + $0x1], 1 }

</bundles_post_ra>
